<compile_context>
chip_gen: v7x
topology: tpu7x:2x2x1
jax: 0.10.0
libtpu: 0.0.40
codegen_flags: <defaults>
</compile_context>

<pallas_src>
import functools
import math

import jax
import jax.numpy as jnp
from jax.experimental import pallas as pl
from jax.experimental.pallas import tpu as pltpu

# Module hyper-parameters (vocab_size comes from `text` in the original
# script; fixed deterministically to 65 = tiny-Shakespeare vocab).
VOCAB_SIZE = 65
N_EMBD = 32
BLOCK_SIZE = 8

VPAD = 128                   # vocab padded to one full lane tile (128 lanes)
NEG = jnp.float32(-1e30)     # fill for padded lanes (safe for logsumexp/bf16)
TILE_M_CAP = 4096            # rows per grid step (≈4.3 MiB double-buffered)


# ----------------------------------------------------------------------------
# Kernels
# ----------------------------------------------------------------------------
def _add_pos(logits, pos_ref, t):
    """Add position logits. pos_ref rows are either 1 (broadcast row),
    tile_m (host-tiled), or t with t % 8 == 0 (tile-aligned reshape)."""
    tile_m, vpad = logits.shape
    tp = pos_ref.shape[0]
    if tp == tile_m or tp == 1:
        return logits + pos_ref[...]
    # tile_m is a multiple of t and t % 8 == 0 here, so the reshape stays
    # (8,128)-tile aligned (no hidden VMEM copies).
    return (logits.reshape(tile_m // t, t, vpad) + pos_ref[...]).reshape(
        tile_m, vpad)


def _bigram_infer_kernel(idx_ref, fused_ref, pos_ref, logits_ref, *, t):
    """Inference path: logits only, no loss code emitted.

    idx_ref    : (TILE_M, 1)        int32
    fused_ref  : (VPAD, VPAD)       f32  tok_tbl @ W^T + b, padded (resident)
    pos_ref    : (1|T|TILE_M, VPAD) f32  pos_tbl @ W^T, padded     (resident)
    logits_ref : (TILE_M, VPAD)     f32 or bf16
    """
    tile_m, vpad = logits_ref.shape
    ids = idx_ref[...]                                               # (TILE_M, 1)
    viota = jax.lax.broadcasted_iota(jnp.int32, (tile_m, vpad), 1)
    onehot = (viota == ids).astype(jnp.float32)                      # (TILE_M, VPAD)

    # Single MXU matmul: row-select of the fused token->logits table.
    logits = jnp.dot(onehot, fused_ref[...],
                     preferred_element_type=jnp.float32)             # (TILE_M, VPAD)
    logits = _add_pos(logits, pos_ref, t)
    logits_ref[...] = logits.astype(logits_ref.dtype)


def _bigram_train_kernel(idxtgt_ref, fused_ref, pos_ref, logits_ref, nll_ref,
                         *, t):
    """Training path: logits + per-row NLL (summed/scaled in the wrapper).

    idxtgt_ref : (TILE_M, 2)    int32  col 0 = idx, col 1 = target
                                        (target == -1 marks padded rows)
    nll_ref    : (TILE_M, 1)    f32    per-row negative log-likelihood
    """
    tile_m, vpad = logits_ref.shape
    ids = idxtgt_ref[:, 0:1]                                         # (TILE_M, 1)
    tgt = idxtgt_ref[:, 1:2]                                         # (TILE_M, 1)
    viota = jax.lax.broadcasted_iota(jnp.int32, (tile_m, vpad), 1)
    onehot = (viota == ids).astype(jnp.float32)

    logits = jnp.dot(onehot, fused_ref[...],
                     preferred_element_type=jnp.float32)
    logits = _add_pos(logits, pos_ref, t)
    logits_ref[...] = logits.astype(logits_ref.dtype)

    # Stable cross-entropy; padded lanes hold -1e30 so they vanish in the lse.
    m = jnp.max(logits, axis=-1, keepdims=True)
    lse = jnp.log(jnp.sum(jnp.exp(logits - m), axis=-1, keepdims=True)) + m
    picked = jnp.sum(jnp.where(viota == tgt, logits, 0.0),
                     axis=-1, keepdims=True)
    nll_ref[...] = jnp.where(tgt >= 0, lse - picked, 0.0)   # mask padded rows


# ----------------------------------------------------------------------------
# Parameter prep (one-time, NOT per forward call)
# ----------------------------------------------------------------------------
def precompute_tables(params):
    """Fold embeddings + lm_head into lookup tables (exact for this model)."""
    v, _ = params["tok_tbl"].shape
    t = params["pos_tbl"].shape[0]
    w_t = params["w"].T.astype(jnp.float32)                          # (E, V), once

    fused_core = params["tok_tbl"].astype(jnp.float32) @ w_t \
        + params["b"].astype(jnp.float32)[None, :]                   # (V, V)
    fused = jnp.zeros((VPAD, VPAD), jnp.float32)
    fused = fused.at[:v, :v].set(fused_core)
    fused = fused.at[:v, v:].set(NEG)        # padded lanes -> -1e30

    pos = jnp.zeros((t, VPAD), jnp.float32)
    pos = pos.at[:, :v].set(params["pos_tbl"].astype(jnp.float32) @ w_t)
    return {"fused": fused, "pos": pos, "vocab": v}


def _round_up(x, m):
    return (x + m - 1) // m * m


def _choose_tile_m(bt, t):
    # multiple of lcm(T, 8): sublane alignment + positions repeat per tile.
    base = (t * 8) // math.gcd(t, 8)
    target = min(TILE_M_CAP, max(base, bt))
    return max(base, (target // base) * base)


def _pos_input(pos, t, tile_m):
    if t % 8 == 0 or t == 1:
        return pos                                  # (T, VPAD), tile-aligned
    return jnp.tile(pos, (tile_m // t, 1))          # (TILE_M, VPAD) fallback


# ----------------------------------------------------------------------------
# Forward wrapper (matches BigramLanguageModel.forward semantics)
# ----------------------------------------------------------------------------
def bigram_forward(tables, idx, targets=None, *, trim=True,
                   logits_dtype=jnp.float32):
    """trim=True matches PyTorch shapes exactly ((B,T,V) or (BT,V)).
    trim=False returns the raw lane/row-padded (padded, 128) logits and
    skips the post-kernel slice copy (padded lanes hold -1e30)."""
    b, t = idx.shape
    v = tables["vocab"]
    bt = b * t
    pos = tables["pos"][:t]

    tile_m = _choose_tile_m(bt, t)
    padded = _round_up(bt, tile_m)
    n_tiles = padded // tile_m
    pos_in = _pos_input(pos, t, tile_m)

    idx_col = idx.reshape(bt, 1).astype(jnp.int32)

    fused_spec = pl.BlockSpec((VPAD, VPAD), lambda i: (0, 0))
    pos_spec = pl.BlockSpec(pos_in.shape, lambda i: (0, 0))

    if targets is None:
        if padded > bt:
            idx_col = jnp.concatenate(
                [idx_col, jnp.zeros((padded - bt, 1), jnp.int32)], axis=0)
        logits_p = pl.pallas_call(
            functools.partial(_bigram_infer_kernel, t=t),
            out_shape=jax.ShapeDtypeStruct((padded, VPAD), logits_dtype),
            grid=(n_tiles,),
            in_specs=[
                pl.BlockSpec((tile_m, 1), lambda i: (i, 0)),     # idx
                fused_spec,                                      # fused table
                pos_spec,                                        # pos logits
            ],
            out_specs=pl.BlockSpec((tile_m, VPAD), lambda i: (i, 0)),
            compiler_params=pltpu.CompilerParams(
                dimension_semantics=("parallel",)),
        )(idx_col, tables["fused"], pos_in)
        if not trim:
            return logits_p, None
        # Matches PyTorch: logits stay (B, T, V) when no targets.
        return logits_p[:bt, :v].reshape(b, t, v), None

    tgt_col = targets.reshape(bt, 1).astype(jnp.int32)
    idxtgt = jnp.concatenate([idx_col, tgt_col], axis=1)             # (BT, 2)
    if padded > bt:
        pad_rows = jnp.concatenate(
            [jnp.zeros((padded - bt, 1), jnp.int32),
             jnp.full((padded - bt, 1), -1, jnp.int32)], axis=1)
        idxtgt = jnp.concatenate([idxtgt, pad_rows], axis=0)

    logits_p, nll = pl.pallas_call(
        functools.partial(_bigram_train_kernel, t=t),
        out_shape=(jax.ShapeDtypeStruct((padded, VPAD), jnp.float32),
                   jax.ShapeDtypeStruct((padded, 1), jnp.float32)),
        grid=(n_tiles,),
        in_specs=[
            pl.BlockSpec((tile_m, 2), lambda i: (i, 0)),         # idx+targets
            fused_spec,                                          # fused table
            pos_spec,                                            # pos logits
        ],
        out_specs=(pl.BlockSpec((tile_m, VPAD), lambda i: (i, 0)),
                   pl.BlockSpec((tile_m, 1), lambda i: (i, 0))),
        compiler_params=pltpu.CompilerParams(
            dimension_semantics=("parallel",)),                  # no cross-tile dep
    )(idxtgt, tables["fused"], pos_in)

    # Padded rows contribute exactly 0 to the sum (masked in-kernel).
    loss = jnp.sum(nll) * jnp.float32(1.0 / bt)
    if not trim:
        return logits_p, loss
    # Matches PyTorch: logits reshaped to (B*T, V) when targets are given.
    return logits_p[:bt, :v], loss


def bigram_last_logits(tables, idx, *, trim=True, logits_dtype=jnp.float32):
    """generate()-oriented variant: logits for the LAST time step only
    (B rows instead of B*T), reusing the same fused/pos tables."""
    b, t = idx.shape
    v = tables["vocab"]
    last = idx[:, t - 1:t].astype(jnp.int32)                         # (B, 1)
    pos_row = tables["pos"][t - 1:t]                                 # (1, VPAD)

    tile_b = min(TILE_M_CAP, _round_up(b, 8))
    padded = _round_up(b, tile_b)
    n_tiles = padded // tile_b
    if padded > b:
        last = jnp.concatenate(
            [last, jnp.zeros((padded - b, 1), jnp.int32)], axis=0)

    logits_p = pl.pallas_call(
        functools.partial(_bigram_infer_kernel, t=1),
        out_shape=jax.ShapeDtypeStruct((padded, VPAD), logits_dtype),
        grid=(n_tiles,),
        in_specs=[
            pl.BlockSpec((tile_b, 1), lambda i: (i, 0)),
            pl.BlockSpec((VPAD, VPAD), lambda i: (0, 0)),
            pl.BlockSpec((1, VPAD), lambda i: (0, 0)),
        ],
        out_specs=pl.BlockSpec((tile_b, VPAD), lambda i: (i, 0)),
        compiler_params=pltpu.CompilerParams(
            dimension_semantics=("parallel",)),
    )(last, tables["fused"], pos_row)
    if not trim:
        return logits_p
    return logits_p[:b, :v]


# ----------------------------------------------------------------------------
# Init + pure-JAX reference
# ----------------------------------------------------------------------------
def init_params(key):
    k_tok, k_pos, k_w, k_b = jax.random.split(key, 4)
    bound = 1.0 / math.sqrt(N_EMBD)
    return {
        "tok_tbl": jax.random.normal(k_tok, (VOCAB_SIZE, N_EMBD), jnp.float32),
        "pos_tbl": jax.random.normal(k_pos, (BLOCK_SIZE, N_EMBD), jnp.float32),
        "w": jax.random.uniform(k_w, (VOCAB_SIZE, N_EMBD), jnp.float32,
                                minval=-bound, maxval=bound),
        "b": jax.random.uniform(k_b, (VOCAB_SIZE,), jnp.float32,
                                minval=-bound, maxval=bound),
    }


def reference_forward(params, idx, targets):
    b, t = idx.shape
    tok_emb = params["tok_tbl"][idx]                      # (B, T, E)
    pos_emb = params["pos_tbl"][jnp.arange(t)]            # (T, E)
    x = tok_emb + pos_emb[None, :, :]
    logits = x @ params["w"].T + params["b"]              # (B, T, V)
    logits = logits.reshape(b * t, VOCAB_SIZE)
    tgt = targets.reshape(b * t)
    lse = jax.nn.logsumexp(logits, axis=-1)
    picked = jnp.take_along_axis(logits, tgt[:, None], axis=-1)[:, 0]
    return logits, jnp.mean(lse - picked)


# TODO(synk): generate() (autoregressive torch.multinomial sampling loop) is
# host-side control flow around forward(); bigram_last_logits provides the
# per-step last-token logits kernel, the sampling loop itself stays in JAX.

if __name__ == "__main__":
    key = jax.random.PRNGKey(0)
    k_params, k_idx, k_tgt = jax.random.split(key, 3)

    params = init_params(k_params)
    tables = precompute_tables(params)        # one-time table fold

    B, T = 2, BLOCK_SIZE
    idx = jax.random.randint(k_idx, (B, T), 0, VOCAB_SIZE, dtype=jnp.int32)
    targets = jax.random.randint(k_tgt, (B, T), 0, VOCAB_SIZE, dtype=jnp.int32)

    # Training path: (B*T, V) logits + scalar loss (grid fully parallel).
    logits, loss = bigram_forward(tables, idx, targets)
    logits = jax.block_until_ready(logits)
    loss = jax.block_until_ready(loss)

    # Inference path: (B, T, V) logits, loss is None (loss code not compiled).
    logits_nt, loss_nt = bigram_forward(tables, idx, None)
    logits_nt = jax.block_until_ready(logits_nt)
    assert loss_nt is None
    assert logits_nt.shape == (B, T, VOCAB_SIZE)

    # Untrimmed bf16 inference path (skips the post-kernel slice copy and
    # halves HBM writeback; padded lanes hold -1e30).
    logits_bf, _ = bigram_forward(tables, idx, None, trim=False,
                                  logits_dtype=jnp.bfloat16)
    logits_bf = jax.block_until_ready(logits_bf)
    assert logits_bf.dtype == jnp.bfloat16

    # generate()-style last-token-only logits.
    last_logits = jax.block_until_ready(bigram_last_logits(tables, idx))
    assert last_logits.shape == (B, VOCAB_SIZE)

    # Correctness vs. pure-JAX reference.
    ref_logits, ref_loss = reference_forward(params, idx, targets)
    assert jnp.allclose(logits, ref_logits, rtol=1e-4, atol=1e-4), "logits mismatch"
    assert jnp.allclose(logits_nt.reshape(B * T, VOCAB_SIZE), ref_logits,
                        rtol=1e-4, atol=1e-4), "inference logits mismatch"
    assert jnp.allclose(loss, ref_loss, rtol=1e-4, atol=1e-4), "loss mismatch"
    assert jnp.allclose(
        last_logits, ref_logits.reshape(B, T, VOCAB_SIZE)[:, -1, :],
        rtol=1e-4, atol=1e-4), "last-token logits mismatch"
    assert jnp.allclose(
        logits_bf[:B * T, :VOCAB_SIZE].astype(jnp.float32), ref_logits,
        rtol=5e-2, atol=5e-2), "bf16 logits mismatch"

    print("KERNEL_OK")
</pallas_src>

<mosaic_0001>
module attributes {stable_mosaic.version = 11 : i64} {
  func.func @_bigram_train_kernel(%arg0: i32, %arg1: memref<16x2xi32, #tpu.memory_space<vmem>>, %arg2: memref<128x128xf32, #tpu.memory_space<vmem>>, %arg3: memref<8x128xf32, #tpu.memory_space<vmem>>, %arg4: memref<16x128xf32, #tpu.memory_space<vmem>>, %arg5: memref<16x1xf32, #tpu.memory_space<vmem>>) attributes {dimension_semantics = [#tpu.dimension_semantics<parallel>], iteration_bounds = array<i64: 1>, scalar_prefetch = 0 : i64, scratch_operands = 0 : i64, tpu.core_type = #tpu.core_type<tc>, window_params = [{transform_indices = @transform_0, window_bounds = array<i64: 16, 2>}, {pipeline_mode = #tpu.pipeline_mode<synchronous>, transform_indices = @transform_1, window_bounds = array<i64: 128, 128>}, {pipeline_mode = #tpu.pipeline_mode<synchronous>, transform_indices = @transform_2, window_bounds = array<i64: 8, 128>}, {transform_indices = @transform_3, window_bounds = array<i64: 16, 128>}, {transform_indices = @transform_4, window_bounds = array<i64: 16, 1>}]} {
    %c0 = arith.constant 0 : index
    %c0_0 = arith.constant 0 : index
    %0 = vector.load %arg1[%c0, %c0_0] : memref<16x2xi32, #tpu.memory_space<vmem>>, vector<16x1xi32>
    %c0_1 = arith.constant 0 : index
    %c1 = arith.constant 1 : index
    %1 = vector.load %arg1[%c0_1, %c1] : memref<16x2xi32, #tpu.memory_space<vmem>>, vector<16x1xi32>
    %2 = tpu.iota {dimensions = array<i32: 1>} : vector<16x128xi32>
    %3 = vector.broadcast %0 : vector<16x1xi32> to vector<16x128xi32>
    %4 = arith.cmpi eq, %2, %3 : vector<16x128xi32>
    %5 = arith.extui %4 : vector<16x128xi1> to vector<16x128xi32>
    %6 = arith.sitofp %5 : vector<16x128xi32> to vector<16x128xf32>
    %c0_2 = arith.constant 0 : index
    %c0_3 = arith.constant 0 : index
    %7 = vector.load %arg2[%c0_2, %c0_3] : memref<128x128xf32, #tpu.memory_space<vmem>>, vector<128x128xf32>
    %cst = arith.constant dense<0.000000e+00> : vector<16x128xf32>
    %8 = tpu.matmul %6, %7, %cst {dimension_numbers = #tpu.dot_dimension_numbers<[1], [0], [0], [1], [0, 0, 1, 1], [], []>} : vector<16x128xf32>, vector<128x128xf32>, vector<16x128xf32> -> vector<16x128xf32>
    %9 = vector.shape_cast %8 : vector<16x128xf32> to vector<2x8x128xf32>
    %c0_4 = arith.constant 0 : index
    %c0_5 = arith.constant 0 : index
    %10 = vector.load %arg3[%c0_4, %c0_5] : memref<8x128xf32, #tpu.memory_space<vmem>>, vector<8x128xf32>
    %11 = vector.shape_cast %10 : vector<8x128xf32> to vector<1x8x128xf32>
    %12 = vector.broadcast %11 : vector<1x8x128xf32> to vector<2x8x128xf32>
    %13 = arith.addf %9, %12 : vector<2x8x128xf32>
    %14 = vector.shape_cast %13 : vector<2x8x128xf32> to vector<16x128xf32>
    %c0_6 = arith.constant 0 : index
    %c0_7 = arith.constant 0 : index
    %15 = vector.load %arg4[%c0_6, %c0_7] : memref<16x128xf32, #tpu.memory_space<vmem>>, vector<16x128xf32>
    tpu.vector_store %arg4[%c0_6, %c0_7], %14 {strides = array<i32>} : memref<16x128xf32, #tpu.memory_space<vmem>>, vector<16x128xf32>,
    %cst_8 = arith.constant dense<0xFF800000> : vector<16xf32>
    %16 = vector.multi_reduction <maximumf>, %14, %cst_8 [1] : vector<16x128xf32> to vector<16xf32>
    %17 = vector.shape_cast %16 : vector<16xf32> to vector<16x1xf32>
    %18 = vector.broadcast %17 : vector<16x1xf32> to vector<16x128xf32>
    %19 = arith.subf %14, %18 : vector<16x128xf32>
    %20 = math.exp %19 : vector<16x128xf32>
    %cst_9 = arith.constant dense<0.000000e+00> : vector<16xf32>
    %21 = vector.multi_reduction <add>, %20, %cst_9 [1] : vector<16x128xf32> to vector<16xf32>
    %22 = vector.shape_cast %21 : vector<16xf32> to vector<16x1xf32>
    %23 = math.log %22 : vector<16x1xf32>
    %24 = arith.addf %23, %17 : vector<16x1xf32>
    %25 = vector.broadcast %1 : vector<16x1xi32> to vector<16x128xi32>
    %26 = arith.cmpi eq, %2, %25 : vector<16x128xi32>
    %cst_10 = arith.constant 0.000000e+00 : f32
    %27 = vector.broadcast %cst_10 : f32 to vector<16x128xf32>
    %28 = arith.select %26, %14, %27 : vector<16x128xi1>, vector<16x128xf32>
    %cst_11 = arith.constant dense<0.000000e+00> : vector<16xf32>
    %29 = vector.multi_reduction <add>, %28, %cst_11 [1] : vector<16x128xf32> to vector<16xf32>
    %30 = vector.shape_cast %29 : vector<16xf32> to vector<16x1xf32>
    %c0_i32 = arith.constant 0 : i32
    %31 = vector.broadcast %c0_i32 : i32 to vector<16x1xi32>
    %32 = arith.cmpi sge, %1, %31 : vector<16x1xi32>
    %33 = arith.subf %24, %30 : vector<16x1xf32>
    %cst_12 = arith.constant 0.000000e+00 : f32
    %34 = vector.broadcast %cst_12 : f32 to vector<16x1xf32>
    %35 = arith.select %32, %33, %34 : vector<16x1xi1>, vector<16x1xf32>
    %c0_13 = arith.constant 0 : index
    %c0_14 = arith.constant 0 : index
    %36 = vector.load %arg5[%c0_13, %c0_14] : memref<16x1xf32, #tpu.memory_space<vmem>>, vector<16x1xf32>
    tpu.vector_store %arg5[%c0_13, %c0_14], %35 {strides = array<i32>} : memref<16x1xf32, #tpu.memory_space<vmem>>, vector<16x1xf32>,
    return
  }
  func.func @transform_0(%arg0: i32) -> (i32, i32) {
    %c0_i32 = arith.constant 0 : i32
    %c0_i32_0 = arith.constant 0 : i32
    return %arg0, %c0_i32 : i32, i32
  }
  func.func @transform_1(%arg0: i32) -> (i32, i32) {
    %c0_i32 = arith.constant 0 : i32
    %c0_i32_0 = arith.constant 0 : i32
    %c0_i32_1 = arith.constant 0 : i32
    return %c0_i32, %c0_i32_0 : i32, i32
  }
  func.func @transform_2(%arg0: i32) -> (i32, i32) {
    %c0_i32 = arith.constant 0 : i32
    %c0_i32_0 = arith.constant 0 : i32
    %c0_i32_1 = arith.constant 0 : i32
    return %c0_i32, %c0_i32_0 : i32, i32
  }
  func.func @transform_3(%arg0: i32) -> (i32, i32) {
    %c0_i32 = arith.constant 0 : i32
    %c0_i32_0 = arith.constant 0 : i32
    return %arg0, %c0_i32 : i32, i32
  }
  func.func @transform_4(%arg0: i32) -> (i32, i32) {
    %c0_i32 = arith.constant 0 : i32
    %c0_i32_0 = arith.constant 0 : i32
    return %arg0, %c0_i32 : i32, i32
  }
}

</mosaic_0001>

<bundles_post_ra>
// kernel: tpu_custom_call.1
= control target key start
LH: loop header
LB: loop body
LE: loop exit
PB: predicated region body
PF: predicated region fallthrough
CT: control target
= control target key end

     0   :  { %10 = vsyncpa [#allocation3], 0  ;;  %s459_s0 = inlined_call_operand.vmem [shape: s32[16,2], index: 0, kind: input, shape index: {}]   ;;  %s460_s1 = inlined_call_operand.hbm [shape: f32[128,128], index: 1, kind: input, shape index: {}]   ;;  %s461_s2 = inlined_call_operand.vmem [shape: f32[8,128], index: 2, kind: input, shape index: {}]   ;;  %s462_s3 = inlined_call_operand.hbm [shape: f32[16,128], index: 3, kind: output, shape index: {0}]   ;;  %s463_s4 = inlined_call_operand.vmem [shape: f32[16,1], index: 4, kind: output, shape index: {1}]  }
   0x1   :  { %11 = vsyncpa [#allocation4], 0  ;;  %s371_s15 = smov [#allocation2]   ;;  %s323_s19 = scalar_lea.hbm %s460_s1, 2048 }
   0x2   :  { %s19_s16 = sshll.u32 %s371_s15, 4  ;;  %p324_p0 = scmp.ne.s32.totalorder %s460_s1, %s323_s19  ;;  %s20_s16 = int_to_ptr.vmem [resolvable:$true] %s19_s16 }
   0x3   :  { %p327_p1 = scmp.lt.u32.totalorder %s323_s19, %s460_s1 }
   0x5   :  { %p329_p2 = pnand %p327_p1, %p324_p0 }
   0x7   :  { %332 = shalt.err (!%p329_p2)
}
   0x8   :  { %s333_s24 = scalar_lea.vmem %s20_s16, 2048  ;;  %p338_p4 = scmp.lt.s32.totalorder %s20_s16, %s20_s16 }
   0x9   :  { %p334_p3 = scmp.ne.s32.totalorder %s20_s16, %s333_s24  ;;  %p339_p5 = scmp.lt.s32.totalorder %s333_s24, %s333_s24 }
   0xb   :  { %p340_p6 = por %p339_p5, %p338_p4 }
   0xd   :  { %p341_p7 = pnand %p340_p6, %p334_p3 }
   0xf   :  { %344 = shalt.err (!%p341_p7)
}
  0x10   :  { %s372_s25 = smov 128   ;;  %s373_s26 = smov 8  }
  0x11   :  { %25 = dma.hbm_to_vmem [thread:$0]  %s460_s1, 2048, %s20_s16, [#allocation3], %s372_s25, %s372_s25, %s373_s26  }
  0x12   :  { %367 = dma.done.wait [#allocation3], 2048  }
  0x13   :  { %368 = vsyncadd [#allocation3], 4294965248  ;;  %v374_v0 = vmov 0   ;;  %v422_v1 = vld [vmem:[%s459_s0] sm:$0xff]  ;;  %v48_v3 = vld [vmem:[#allocation2 + $0x8] sm:$0xff]  ;;  %v375_v14 = vmov 1   ;;  %v33_v28 = vlaneseq }
  0x14   :  { %312 = vset.pattern.permute.xlu0 %v374_v0  ;;  %v47_v2 = vld [vmem:[#allocation2] sm:$0xff]  ;;  %v49_v4 = vld [vmem:[#allocation2 + $0x10] sm:$0xff]  ;;  %v50_v5 = vld [vmem:[#allocation2 + $0x18] sm:$0xff]  ;;  %314 = vset.pattern.permute.xlu1 %v375_v14  ;;  %v376_v31 = vmov 1.0  }
  0x15   :  { %36 = vperm.xlu0 %312, %v422_v1   ;;  %v428_v6 = vld [vmem:[%s459_s0 + $0x8] sm:$0xff]  ;;  %v272_v7 = vpack.c.bf16 %v48_v3, %v47_v2  ;;  %v276_v8 = vpack.c.bf16 %v50_v5, %v49_v4  ;;  %v51_v9 = vld [vmem:[#allocation2 + $0x20] sm:$0xff]  ;;  %v53_v12 = vld [vmem:[#allocation2 + $0x30] sm:$0xff]  ;;  %v34_v29 = vand.u32 127, %v33_v28 }
  0x16   :  { %v52_v10 = vld [vmem:[#allocation2 + $0x28] sm:$0xff]  ;;  %v54_v13 = vld [vmem:[#allocation2 + $0x38] sm:$0xff]  ;;  %v55_v16 = vld [vmem:[#allocation2 + $0x40] sm:$0xff] }
  0x17   :  { %273 = vmatprep.subr.bf16.mxu0 %v272_v7  ;;  %v280_v11 = vpack.c.bf16 %v52_v10, %v51_v9  ;;  %v284_v15 = vpack.c.bf16 %v54_v13, %v53_v12  ;;  %v56_v17 = vld [vmem:[#allocation2 + $0x48] sm:$0xff]  ;;  %v57_v19 = vld [vmem:[#allocation2 + $0x50] sm:$0xff]  ;;  %v58_v20 = vld [vmem:[#allocation2 + $0x58] sm:$0xff] }
  0x18   :  { %275 = vmatpush3.bf16.msra.mxu0 %v272_v7  ;;  %v288_v18 = vpack.c.bf16 %v56_v17, %v55_v16  ;;  %v292_v21 = vpack.c.bf16 %v58_v20, %v57_v19  ;;  %v59_v22 = vld [vmem:[#allocation2 + $0x60] sm:$0xff]  ;;  %v60_v23 = vld [vmem:[#allocation2 + $0x68] sm:$0xff]  ;;  %v61_v25 = vld [vmem:[#allocation2 + $0x70] sm:$0xff] }
  0x19   :  { %39 = vperm.xlu0 %312, %v428_v6   ;;  %277 = vmatprep.subr.bf16.mxu0 %v276_v8  ;;  %v296_v24 = vpack.c.bf16 %v60_v23, %v59_v22  ;;  %v62_v26 = vld [vmem:[#allocation2 + $0x78] sm:$0xff]  ;;  %v138_v33 = vld [vmem:[%s461_s2] sm:$0xff]  ;;  %s377_s2 = smov [#allocation5]  }
  0x1a   :  { %v300_v27 = vpack.c.bf16 %v62_v26, %v61_v25  ;;  %s199_s7 = sshll.u32 %s377_s2, 4  ;;  %s200_s7 = int_to_ptr.vmem [resolvable:$true] %s199_s7 }
  0x1b   :  { %s345_s8 = scalar_lea.vmem %s200_s7, 256  ;;  %p350_p9 = scmp.lt.s32.totalorder %s200_s7, %s200_s7 }
  0x1c   :  { %279 = vmatpush3.bf16.msra.mxu0 %v276_v8  ;;  %p346_p8 = scmp.ne.s32.totalorder %s200_s7, %s345_s8  ;;  %p351_p10 = scmp.lt.s32.totalorder %s345_s8, %s345_s8 }
  0x1d   :  { %313 = vset.pattern.permute.xlu0 %v375_v14  ;;  %281 = vmatprep.subr.bf16.mxu0 %v280_v11 }
  0x1e   :  { %164 = vperm.xlu0 %313, %v422_v1   ;;  %p352_p11 = por %p351_p10, %p350_p9 }
  0x20   :  { %283 = vmatpush3.bf16.msra.mxu0 %v280_v11  ;;  %p353_p12 = pnand %p352_p11, %p346_p8 }
  0x21   :  { %285 = vmatprep.subr.bf16.mxu0 %v284_v15 }
  0x24   :  { %287 = vmatpush3.bf16.msra.mxu0 %v284_v15 }
  0x25   :  { %289 = vmatprep.subr.bf16.mxu0 %v288_v18 }
  0x28   :  { %291 = vmatpush3.bf16.msra.mxu0 %v288_v18 }
  0x29   :  { %293 = vmatprep.subr.bf16.mxu0 %v292_v21 }
  0x2c   :  { %295 = vmatpush3.bf16.msra.mxu0 %v292_v21 }
  0x2d   :  { %297 = vmatprep.subr.bf16.mxu0 %v296_v24 }
  0x30   :  { %299 = vmatpush3.bf16.msra.mxu0 %v296_v24 }
  0x31   :  { %301 = vmatprep.subr.bf16.mxu0 %v300_v27 }
  0x34   :  { %303 = vmatpush3.bf16.msra.mxu0 %v300_v27 }
  0x94   :  { %v37_v30 = vpop.permute.xlu0 %36 }
  0x95   :  { %vm41_vm0 = vcmp.eq.s32.totalorder %v34_v29, %v37_v30 }
  0x96   :  { %269 = vmatprep.mubr.msk.f32.mxu0 %vm41_vm0, %v376_v31 }
  0x98   :  { %v40_v32 = vpop.permute.xlu0 %39 }
  0x99   :  { %vm42_vm1 = vcmp.eq.s32.totalorder %v34_v29, %v40_v32 }
  0x9a   :  { %270 = vmatmul.mubr.msk.f32.vlgmr.msra.gmra.mrb[0].mxu0 %vm42_vm1, %v376_v31 }
  0x9d   :  { %v165_v45 = vpop.permute.xlu0 %164 }
  0x9e   :  { %vm169_vm2 = vcmp.eq.s32.totalorder %v34_v29, %v165_v45 }
 0x16d   :  { %v271_v34 = vpop.f32.mrb[0].mxu0 }
 0x16e   :  { %v140_v35 = vadd.f32 %v271_v34, %v138_v33  ;;  %v129_v36 = vpop.f32.mrb[1].mxu0 }
 0x16f   :  { %v139_v37 = vadd.f32 %v138_v33, %v129_v36 }
 0x170   :  { %142 = vst [vmem:[#allocation5 + $0x8] sm:$0xff] %v140_v35  ;;  %145 = vmax.xlane.f32.xlu1 %v140_v35 }
 0x171   :  { %141 = vst [vmem:[#allocation5] sm:$0xff] %v139_v37  ;;  %v171_v48 = vsel %vm169_vm2, %v139_v37, 0.0 }
 0x174   :  { %143 = vmax.xlane.f32.xlu1 %v139_v37 }
 0x185   :  { %167 = vperm.xlu1 %314, %v428_v6  }
 0x1fd   :  { %v146_v38 = vpop.xlane.xlu1 %145 }
 0x1fe   :  { %v148_v39 = vsub.f32 %v140_v35, %v146_v38 }
 0x200   :  { %v151_v40 = vmul.f32 1.442695, %v148_v39 }
 0x201   :  { %v144_v41 = vpop.xlane.xlu1 %143 }
 0x202   :  { %315 = vpow2.f32 %v151_v40  ;;  %v147_v42 = vsub.f32 %v139_v37, %v144_v41 }
 0x204   :  { %v149_v43 = vmul.f32 1.442695, %v147_v42 }
 0x205   :  { %v168_v47 = vpop.permute.xlu1 %167 }
 0x206   :  { %317 = vpow2.f32 %v149_v43  ;;  %vm170_vm3 = vcmp.eq.s32.totalorder %v34_v29, %v168_v47 }
 0x207   :  { %v172_v49 = vsel %vm170_vm3, %v140_v35, 0.0 }
 0x20c   :  { %v316_v44 = vpop.eup %315 }
 0x20d   :  { %155 = vadd.xlane.f32.xlu1 %v316_v44 }
 0x210   :  { %v318_v46 = vpop.eup %317 }
 0x211   :  { %153 = vadd.xlane.f32.xlu0 %v318_v46 }
 0x215   :  { %173 = vadd.xlane.f32.xlu0 %v171_v48 }
 0x219   :  { %175 = vadd.xlane.f32.xlu0 %v172_v49 }
 0x29a   :  { %v156_v50 = vpop.xlane.xlu1 %155 }
 0x29b   :  { %319 = vlog2.f32 %v156_v50 }
 0x29e   :  { %v154_v51 = vpop.xlane.xlu0 %153 }
 0x29f   :  { %321 = vlog2.f32 %v154_v51 }
 0x2a2   :  { %v174_v52 = vpop.xlane.xlu0 %173 }
 0x2a3   :  { %356 = shalt.err (!%p353_p12)
}
 0x2a4   :  { %s357_s11 = scalar_lea.hbm %s462_s3, 256 }
 0x2a5   :  { %p358_p13 = scmp.ne.s32.totalorder %s462_s3, %s357_s11  ;;  %p361_p0 = scmp.lt.u32.totalorder %s357_s11, %s462_s3 }
 0x2a7   :  { %p363_p1 = pnand %p361_p0, %p358_p13 }
 0x2a9   :  { %366 = shalt.err (!%p363_p1)
}
 0x2aa   :  { %205 = dma.vmem_to_hbm [thread:$0]  %s200_s7, 256, %s462_s3, [#allocation4], %s372_s25, %s372_s25, %s373_s26   ;;  %v320_v53 = vpop.eup %319  ;;  %v176_v57 = vpop.xlane.xlu0 %175  ;;  %vm178_vm4 = vcmp.ge.s32.totalorder %v428_v6, 0  ;;  %vm177_vm5 = vcmp.ge.s32.totalorder %v422_v1, 0  ;;  %vm191_vm6 = vcmask 7168  }
 0x2ab   :  { %v160_v54 = vmul.f32 0.6931472, %v320_v53  ;;  %v322_v56 = vpop.eup %321  ;;  %s378_s18 = smov 127  }
 0x2ac   :  { %v158_v58 = vmul.f32 0.6931472, %v322_v56 }
 0x2ad   :  { %v162_v55 = vadd.f32 %v160_v54, %v146_v38 }
 0x2ae   :  { %v161_v60 = vadd.f32 %v158_v58, %v144_v41 }
 0x2af   :  { %v180_v59 = vsub.f32 %v162_v55, %v176_v57 }
 0x2b0   :  { %v179_v62 = vsub.f32 %v161_v60, %v174_v52 }
 0x2b1   :  { %v182_v61 = vsel %vm178_vm4, %v180_v59, 0.0 }
 0x2b2   :  { %187 = vrot.lane.b32.xlu1 %v182_v61, %s378_s18  ;;  %v181_v63 = vsel %vm177_vm5, %v179_v62, 0.0 }
 0x2b3   :  { %185 = vrot.lane.b32.xlu0 %v181_v63, %s378_s18 }
 0x324   :  { %v188_v0 = vpop.permute.xlu1 %187 }
 0x325   :  { %193 = vst.msk [vmem:[%s463_s4 + $0x8] sm:$0xff] %vm191_vm6, %v188_v0  ;;  %v186_v2 = vpop.permute.xlu0 %185 }
 0x326   :  { %192 = vst.msk [vmem:[%s463_s4] sm:$0xff] %vm191_vm6, %v186_v2 }
 0x327   :  { %369 = dma.done.wait [#allocation4], 256  }
 0x328   :  { %370 = vsyncadd [#allocation4], 4294967040 }
 0x329   :  { %213 = vsyncpa [#allocation3], 1 }
 0x32a   :  { %214 = vsyncpa [#allocation4], 1 }

</bundles_post_ra>
